<compile_context>
chip_gen: v7x
topology: tpu7x:2x2x1
jax: 0.10.0
libtpu: 0.0.40
codegen_flags: <defaults>
</compile_context>

<pallas_src>
import functools

import jax
import jax.numpy as jnp
from jax.experimental import pallas as pl
from jax.experimental.pallas import tpu as pltpu

TEMPERATURE = 0.07
BASE_TEMPERATURE = 0.07
COSINE_EPS = 1e-8  # torch.nn.CosineSimilarity default eps


def _round_up(x, m):
    return ((x + m - 1) // m) * m


def _fold_lanes(x):
    """[tm, tn] -> [tm, 128] by summing aligned 128-lane slabs (VALU only)."""
    tm, tn = x.shape
    acc = x[:, 0:128]
    for c in range(128, tn, 128):
        acc = acc + x[:, c:c + 128]
    return acc


def _supcon_kernel(n_valid, has_tail_pad, inv_pos_cnt,
                   q_ref, k_ref, rsid_ref, csid_ref, out_ref,
                   sum_exp_ref, sum_pos_ref):
    """One (row-block i, col-block j) step of the streamed SupCon reduction."""
    i = pl.program_id(0)
    j = pl.program_id(1)
    tm = q_ref.shape[0]
    tn = k_ref.shape[0]

    @pl.when(j == 0)
    def _init():
        sum_exp_ref[...] = jnp.zeros_like(sum_exp_ref)
        sum_pos_ref[...] = jnp.zeros_like(sum_pos_ref)

    # [tm, tn] logits tile on the MXU: bf16 operands, f32 accumulation.
    # 1/temperature is folded into q and both operands are pre-normalized,
    # so this IS cosine_similarity / temperature.
    logits = jax.lax.dot_general(
        q_ref[...], k_ref[...],
        dimension_numbers=(((1,), (1,)), ((), ())),
        preferred_element_type=jnp.float32,
    )

    # Positive iff same sample id. Padded contrast columns carry sid = -1 in
    # the wrapper, so they can never register as positives on any path.
    pos = rsid_ref[...] == csid_ref[...]                       # [tm, tn] bool

    # Masking is only semantically needed on diagonal tiles (self-contrast
    # exclusion) and, when N was padded, on the last column block.
    needs_mask = i == j
    if has_tail_pad:
        needs_mask = jnp.logical_or(needs_mask, j == pl.num_programs(1) - 1)

    @pl.when(jnp.logical_not(needs_mask))
    def _fast():  # interior tile: no logits mask at all
        sum_exp_ref[...] += _fold_lanes(jnp.exp(logits))
        sum_pos_ref[...] += _fold_lanes(jnp.where(pos, logits, 0.0))

    @pl.when(needs_mask)
    def _masked():  # diagonal tile and/or padded tail column block
        row_g = i * tm + jax.lax.broadcasted_iota(jnp.int32, (tm, tn), 0)
        col_g = j * tn + jax.lax.broadcasted_iota(jnp.int32, (tm, tn), 1)
        lm = jnp.logical_and(row_g != col_g, col_g < n_valid)
        pm = jnp.logical_and(pos, lm)
        sum_exp_ref[...] += _fold_lanes(jnp.where(lm, jnp.exp(logits), 0.0))
        sum_pos_ref[...] += _fold_lanes(jnp.where(pm, logits, 0.0))

    @pl.when(j == pl.num_programs(1) - 1)
    def _finalize():
        # Single cross-lane reduce per row block (XLU), only once per row.
        se = jnp.sum(sum_exp_ref[...], axis=1, keepdims=True)     # [tm, 1]
        sp = jnp.sum(sum_pos_ref[...], axis=1, keepdims=True)     # [tm, 1]
        # mean_log_prob_pos = sum(pos*logits)/(n_views-1) - log(sum masked exp)
        mlpp = sp * inv_pos_cnt - jnp.log(se)
        # Lane-dense writeback; padded rows are sliced off in the wrapper.
        out_ref[...] = jnp.broadcast_to(mlpp, (tm, 128))


def supcon_loss(features, *, block=512):
    """features: [bsz, n_views, dim] float32 -> scalar SimCLR/SupCon loss."""
    bsz, n_views, dim = features.shape
    n = bsz * n_views

    # contrast_feature = torch.cat(torch.unbind(features, 1), 0): view-major rows.
    feat = jnp.transpose(features, (1, 0, 2)).reshape(n, dim).astype(jnp.float32)

    # Pre-normalize once (O(N*D)) instead of dividing the [N, N] dots matrix.
    norm = jnp.sqrt(jnp.sum(feat * feat, axis=-1, keepdims=True))
    feat_n = feat / jnp.maximum(norm, COSINE_EPS)

    # bf16 MXU operands; fold 1/temperature into the anchor operand only.
    q = (feat_n * (1.0 / TEMPERATURE)).astype(jnp.bfloat16)
    k = feat_n.astype(jnp.bfloat16)

    # Tile sizing: always a multiple of 128 (lane-aligned fold / BlockSpecs).
    block = max(128, _round_up(block, 128))
    t = min(_round_up(n, 128), block)
    n_pad = _round_up(n, t)

    if n_pad != n:
        pad = ((0, n_pad - n), (0, 0))
        q = jnp.pad(q, pad)
        k = jnp.pad(k, pad)

    # Sample ids (row % bsz) as tiny per-row / per-column int32 vectors; padded
    # contrast columns get -1 so they never match any anchor's id.
    idx = jnp.arange(n_pad, dtype=jnp.int32)
    sid = jnp.where(idx < n, idx % bsz, -1)
    rsid = sid.reshape(n_pad, 1)
    csid = sid.reshape(1, n_pad)

    grid = (n_pad // t, n_pad // t)
    has_tail_pad = n_pad != n
    # SimCLR positive count per anchor is exactly n_views - 1 (other views of
    # the same sample, self excluded).
    inv_pos_cnt = (1.0 / float(n_views - 1)) if n_views > 1 else float("nan")

    out = pl.pallas_call(
        functools.partial(_supcon_kernel, n, has_tail_pad, inv_pos_cnt),
        out_shape=jax.ShapeDtypeStruct((n_pad, 128), jnp.float32),
        grid_spec=pltpu.PrefetchScalarGridSpec(
            num_scalar_prefetch=0,
            grid=grid,
            in_specs=[
                pl.BlockSpec((t, dim), lambda i, j: (i, 0)),   # q (anchor) rows
                pl.BlockSpec((t, dim), lambda i, j: (j, 0)),   # k (contrast) rows
                pl.BlockSpec((t, 1), lambda i, j: (i, 0)),     # row sample ids
                pl.BlockSpec((1, t), lambda i, j: (0, j)),     # col sample ids
            ],
            out_specs=pl.BlockSpec((t, 128), lambda i, j: (i, 0)),
            scratch_shapes=[pltpu.VMEM((t, 128), jnp.float32)] * 2,
        ),
        compiler_params=pltpu.CompilerParams(
            dimension_semantics=("parallel", "arbitrary"),
            vmem_limit_bytes=48 * 1024 * 1024,
        ),
    )(q, k, rsid, csid)

    mean_log_prob_pos = out[:n, 0]
    return -(TEMPERATURE / BASE_TEMPERATURE) * jnp.mean(mean_log_prob_pos)


def _supcon_loss_ref(features):
    """Pure-JAX f32 reference mirroring the PyTorch forward exactly."""
    bsz, n_views, dim = features.shape
    n = bsz * n_views
    feat = jnp.transpose(features, (1, 0, 2)).reshape(n, dim).astype(jnp.float32)
    norms = jnp.sqrt(jnp.sum(feat * feat, axis=-1, keepdims=True))
    cos = (feat @ feat.T) / jnp.maximum(norms * norms.T, COSINE_EPS)
    logits = cos / TEMPERATURE
    mask = jnp.tile(jnp.eye(bsz, dtype=jnp.float32), (n_views, n_views))
    logits_mask = 1.0 - jnp.eye(n, dtype=jnp.float32)
    mask = mask * logits_mask
    exp_logits = jnp.exp(logits) * logits_mask
    log_prob = logits - jnp.log(jnp.sum(exp_logits, axis=1, keepdims=True))
    mlpp = jnp.sum(mask * log_prob, axis=1) / jnp.sum(mask, axis=1)
    return -(TEMPERATURE / BASE_TEMPERATURE) * jnp.mean(mlpp)


if __name__ == "__main__":
    key = jax.random.PRNGKey(0)
    k1, k2, k3 = jax.random.split(key, 3)

    # Tolerance note: kernel uses bf16 MXU operands (f32 accumulation);
    # reference is full f32.
    rtol, atol = 2e-2, 2e-2

    # A: tiny config, single padded tile (N=16 -> 128), masked path only.
    feats_a = jax.random.normal(k1, (8, 2, 32), dtype=jnp.float32)
    loss_a = jax.block_until_ready(supcon_loss(feats_a))
    ref_a = jax.block_until_ready(_supcon_loss_ref(feats_a))
    assert jnp.allclose(loss_a, ref_a, rtol=rtol, atol=atol), (loss_a, ref_a)

    # B: padded tail + fast path (N=160 -> 256, T=128, grid (2,2)):
    #    tile (1,0) is an interior fast-path tile, (0,1)/(1,1) hit tail masking.
    feats_b = jax.random.normal(k2, (80, 2, 32), dtype=jnp.float32)
    loss_b = jax.block_until_ready(supcon_loss(feats_b, block=128))
    ref_b = jax.block_until_ready(_supcon_loss_ref(feats_b))
    assert jnp.allclose(loss_b, ref_b, rtol=rtol, atol=atol), (loss_b, ref_b)

    # C: exact multiple, no padding (N=256, T=128, grid (2,2)): off-diagonal
    #    tiles take the fast path with no tail masking anywhere.
    feats_c = jax.random.normal(k3, (128, 2, 32), dtype=jnp.float32)
    loss_c = jax.block_until_ready(supcon_loss(feats_c, block=128))
    ref_c = jax.block_until_ready(_supcon_loss_ref(feats_c))
    assert jnp.allclose(loss_c, ref_c, rtol=rtol, atol=atol), (loss_c, ref_c)

    print("KERNEL_OK")
</pallas_src>

<mosaic_0001>
module attributes {stable_mosaic.version = 11 : i64} {
  func.func @_supcon_kernel(%arg0: i32, %arg1: i32, %arg2: memref<128x32xbf16, #tpu.memory_space<vmem>>, %arg3: memref<128x32xbf16, #tpu.memory_space<vmem>>, %arg4: memref<128x1xi32, #tpu.memory_space<vmem>>, %arg5: memref<1x128xi32, #tpu.memory_space<vmem>>, %arg6: memref<128x128xf32, #tpu.memory_space<vmem>>, %arg7: memref<128x128xf32, #tpu.memory_space<vmem>>, %arg8: memref<128x128xf32, #tpu.memory_space<vmem>>) attributes {dimension_semantics = [#tpu.dimension_semantics<parallel>, #tpu.dimension_semantics<arbitrary>], iteration_bounds = array<i64: 1, 1>, scalar_prefetch = 0 : i64, scratch_operands = 2 : i64, tpu.core_type = #tpu.core_type<tc>, window_params = [{transform_indices = @transform_0, window_bounds = array<i64: 128, 32>}, {transform_indices = @transform_1, window_bounds = array<i64: 128, 32>}, {transform_indices = @transform_2, window_bounds = array<i64: 128, 1>}, {transform_indices = @transform_3, window_bounds = array<i64: 1, 128>}, {transform_indices = @transform_4, window_bounds = array<i64: 128, 128>}]} {
    %c0_i32 = arith.constant 0 : i32
    %0 = arith.cmpi eq, %arg1, %c0_i32 : i32
    %1 = arith.extui %0 : i1 to i32
    %c0_i32_0 = arith.constant 0 : i32
    %2 = arith.cmpi ne, %1, %c0_i32_0 : i32
    scf.if %2 {
      %cst_13 = arith.constant 0.000000e+00 : f32
      %22 = vector.broadcast %cst_13 : f32 to vector<128x128xf32>
      %c0_14 = arith.constant 0 : index
      %c0_15 = arith.constant 0 : index
      %23 = vector.load %arg7[%c0_14, %c0_15] : memref<128x128xf32, #tpu.memory_space<vmem>>, vector<128x128xf32>
      tpu.vector_store %arg7[%c0_14, %c0_15], %22 {strides = array<i32>} : memref<128x128xf32, #tpu.memory_space<vmem>>, vector<128x128xf32>,
      %cst_16 = arith.constant 0.000000e+00 : f32
      %24 = vector.broadcast %cst_16 : f32 to vector<128x128xf32>
      %c0_17 = arith.constant 0 : index
      %c0_18 = arith.constant 0 : index
      %25 = vector.load %arg8[%c0_17, %c0_18] : memref<128x128xf32, #tpu.memory_space<vmem>>, vector<128x128xf32>
      tpu.vector_store %arg8[%c0_17, %c0_18], %24 {strides = array<i32>} : memref<128x128xf32, #tpu.memory_space<vmem>>, vector<128x128xf32>,
    } else {
    }
    %c0 = arith.constant 0 : index
    %c0_1 = arith.constant 0 : index
    %3 = vector.load %arg2[%c0, %c0_1] : memref<128x32xbf16, #tpu.memory_space<vmem>>, vector<128x32xbf16>
    %c0_2 = arith.constant 0 : index
    %c0_3 = arith.constant 0 : index
    %4 = vector.load %arg3[%c0_2, %c0_3] : memref<128x32xbf16, #tpu.memory_space<vmem>>, vector<128x32xbf16>
    %cst = arith.constant dense<0.000000e+00> : vector<128x128xf32>
    %5 = tpu.matmul %3, %4, %cst {dimension_numbers = #tpu.dot_dimension_numbers<[1], [1], [0], [0], [0, 0, 1, 0], [], []>} : vector<128x32xbf16>, vector<128x32xbf16>, vector<128x128xf32> -> vector<128x128xf32>
    %c0_4 = arith.constant 0 : index
    %c0_5 = arith.constant 0 : index
    %6 = vector.load %arg4[%c0_4, %c0_5] : memref<128x1xi32, #tpu.memory_space<vmem>>, vector<128x1xi32>
    %c0_6 = arith.constant 0 : index
    %c0_7 = arith.constant 0 : index
    %7 = vector.load %arg5[%c0_6, %c0_7] : memref<1x128xi32, #tpu.memory_space<vmem>>, vector<1x128xi32>
    %8 = vector.broadcast %6 : vector<128x1xi32> to vector<128x128xi32>
    %9 = vector.broadcast %7 : vector<1x128xi32> to vector<128x128xi32>
    %10 = arith.cmpi eq, %8, %9 : vector<128x128xi32>
    %11 = arith.cmpi eq, %arg0, %arg1 : i32
    %c0_i32_8 = arith.constant 0 : i32
    %12 = arith.cmpi eq, %arg1, %c0_i32_8 : i32
    %13 = arith.ori %11, %12 : i1
    %true = arith.constant true
    %14 = arith.xori %13, %true : i1
    %15 = arith.extui %14 : i1 to i32
    %c0_i32_9 = arith.constant 0 : i32
    %16 = arith.cmpi ne, %15, %c0_i32_9 : i32
    scf.if %16 {
      %c0_13 = arith.constant 0 : index
      %c0_14 = arith.constant 0 : index
      %22 = vector.load %arg7[%c0_13, %c0_14] : memref<128x128xf32, #tpu.memory_space<vmem>>, vector<128x128xf32>
      %23 = math.exp %5 : vector<128x128xf32>
      %24 = arith.addf %22, %23 : vector<128x128xf32>
      %c0_15 = arith.constant 0 : index
      %c0_16 = arith.constant 0 : index
      %25 = vector.load %arg7[%c0_15, %c0_16] : memref<128x128xf32, #tpu.memory_space<vmem>>, vector<128x128xf32>
      tpu.vector_store %arg7[%c0_15, %c0_16], %24 {strides = array<i32>} : memref<128x128xf32, #tpu.memory_space<vmem>>, vector<128x128xf32>,
      %c0_17 = arith.constant 0 : index
      %c0_18 = arith.constant 0 : index
      %26 = vector.load %arg8[%c0_17, %c0_18] : memref<128x128xf32, #tpu.memory_space<vmem>>, vector<128x128xf32>
      %cst_19 = arith.constant 0.000000e+00 : f32
      %27 = vector.broadcast %cst_19 : f32 to vector<128x128xf32>
      %28 = arith.select %10, %5, %27 : vector<128x128xi1>, vector<128x128xf32>
      %29 = arith.addf %26, %28 : vector<128x128xf32>
      %c0_20 = arith.constant 0 : index
      %c0_21 = arith.constant 0 : index
      %30 = vector.load %arg8[%c0_20, %c0_21] : memref<128x128xf32, #tpu.memory_space<vmem>>, vector<128x128xf32>
      tpu.vector_store %arg8[%c0_20, %c0_21], %29 {strides = array<i32>} : memref<128x128xf32, #tpu.memory_space<vmem>>, vector<128x128xf32>,
    } else {
    }
    %17 = arith.extui %13 : i1 to i32
    %c0_i32_10 = arith.constant 0 : i32
    %18 = arith.cmpi ne, %17, %c0_i32_10 : i32
    scf.if %18 {
      %c128_i32 = arith.constant 128 : i32
      %22 = arith.muli %arg0, %c128_i32 : i32
      %23 = tpu.iota {dimensions = array<i32: 0>} : vector<128x128xi32>
      %24 = vector.broadcast %22 : i32 to vector<128x128xi32>
      %25 = arith.addi %24, %23 : vector<128x128xi32>
      %c128_i32_13 = arith.constant 128 : i32
      %26 = arith.muli %arg1, %c128_i32_13 : i32
      %27 = tpu.iota {dimensions = array<i32: 1>} : vector<128x128xi32>
      %28 = vector.broadcast %26 : i32 to vector<128x128xi32>
      %29 = arith.addi %28, %27 : vector<128x128xi32>
      %30 = arith.cmpi ne, %25, %29 : vector<128x128xi32>
      %c16_i32 = arith.constant 16 : i32
      %31 = vector.broadcast %c16_i32 : i32 to vector<128x128xi32>
      %32 = arith.cmpi slt, %29, %31 : vector<128x128xi32>
      %33 = arith.andi %30, %32 : vector<128x128xi1>
      %34 = arith.andi %10, %33 : vector<128x128xi1>
      %c0_14 = arith.constant 0 : index
      %c0_15 = arith.constant 0 : index
      %35 = vector.load %arg7[%c0_14, %c0_15] : memref<128x128xf32, #tpu.memory_space<vmem>>, vector<128x128xf32>
      %36 = math.exp %5 : vector<128x128xf32>
      %cst_16 = arith.constant 0.000000e+00 : f32
      %37 = vector.broadcast %cst_16 : f32 to vector<128x128xf32>
      %38 = arith.select %33, %36, %37 : vector<128x128xi1>, vector<128x128xf32>
      %39 = arith.addf %35, %38 : vector<128x128xf32>
      %c0_17 = arith.constant 0 : index
      %c0_18 = arith.constant 0 : index
      %40 = vector.load %arg7[%c0_17, %c0_18] : memref<128x128xf32, #tpu.memory_space<vmem>>, vector<128x128xf32>
      tpu.vector_store %arg7[%c0_17, %c0_18], %39 {strides = array<i32>} : memref<128x128xf32, #tpu.memory_space<vmem>>, vector<128x128xf32>,
      %c0_19 = arith.constant 0 : index
      %c0_20 = arith.constant 0 : index
      %41 = vector.load %arg8[%c0_19, %c0_20] : memref<128x128xf32, #tpu.memory_space<vmem>>, vector<128x128xf32>
      %cst_21 = arith.constant 0.000000e+00 : f32
      %42 = vector.broadcast %cst_21 : f32 to vector<128x128xf32>
      %43 = arith.select %34, %5, %42 : vector<128x128xi1>, vector<128x128xf32>
      %44 = arith.addf %41, %43 : vector<128x128xf32>
      %c0_22 = arith.constant 0 : index
      %c0_23 = arith.constant 0 : index
      %45 = vector.load %arg8[%c0_22, %c0_23] : memref<128x128xf32, #tpu.memory_space<vmem>>, vector<128x128xf32>
      tpu.vector_store %arg8[%c0_22, %c0_23], %44 {strides = array<i32>} : memref<128x128xf32, #tpu.memory_space<vmem>>, vector<128x128xf32>,
    } else {
    }
    %c0_i32_11 = arith.constant 0 : i32
    %19 = arith.cmpi eq, %arg1, %c0_i32_11 : i32
    %20 = arith.extui %19 : i1 to i32
    %c0_i32_12 = arith.constant 0 : i32
    %21 = arith.cmpi ne, %20, %c0_i32_12 : i32
    scf.if %21 {
      %c0_13 = arith.constant 0 : index
      %c0_14 = arith.constant 0 : index
      %22 = vector.load %arg7[%c0_13, %c0_14] : memref<128x128xf32, #tpu.memory_space<vmem>>, vector<128x128xf32>
      %cst_15 = arith.constant dense<0.000000e+00> : vector<128xf32>
      %23 = vector.multi_reduction <add>, %22, %cst_15 [1] : vector<128x128xf32> to vector<128xf32>
      %24 = vector.shape_cast %23 : vector<128xf32> to vector<128x1xf32>
      %c0_16 = arith.constant 0 : index
      %c0_17 = arith.constant 0 : index
      %25 = vector.load %arg8[%c0_16, %c0_17] : memref<128x128xf32, #tpu.memory_space<vmem>>, vector<128x128xf32>
      %cst_18 = arith.constant dense<0.000000e+00> : vector<128xf32>
      %26 = vector.multi_reduction <add>, %25, %cst_18 [1] : vector<128x128xf32> to vector<128xf32>
      %27 = vector.shape_cast %26 : vector<128xf32> to vector<128x1xf32>
      %cst_19 = arith.constant 1.000000e+00 : f32
      %28 = vector.broadcast %cst_19 : f32 to vector<128x1xf32>
      %29 = arith.mulf %27, %28 : vector<128x1xf32>
      %30 = math.log %24 : vector<128x1xf32>
      %31 = arith.subf %29, %30 : vector<128x1xf32>
      %32 = vector.shape_cast %31 : vector<128x1xf32> to vector<128x1xf32>
      %33 = vector.broadcast %32 : vector<128x1xf32> to vector<128x128xf32>
      %c0_20 = arith.constant 0 : index
      %c0_21 = arith.constant 0 : index
      %34 = vector.load %arg6[%c0_20, %c0_21] : memref<128x128xf32, #tpu.memory_space<vmem>>, vector<128x128xf32>
      tpu.vector_store %arg6[%c0_20, %c0_21], %33 {strides = array<i32>} : memref<128x128xf32, #tpu.memory_space<vmem>>, vector<128x128xf32>,
    } else {
    }
    return
  }
  func.func @transform_0(%arg0: i32, %arg1: i32) -> (i32, i32) {
    %c0_i32 = arith.constant 0 : i32
    %c0_i32_0 = arith.constant 0 : i32
    return %arg0, %c0_i32 : i32, i32
  }
  func.func @transform_1(%arg0: i32, %arg1: i32) -> (i32, i32) {
    %c0_i32 = arith.constant 0 : i32
    %c0_i32_0 = arith.constant 0 : i32
    return %arg1, %c0_i32 : i32, i32
  }
  func.func @transform_2(%arg0: i32, %arg1: i32) -> (i32, i32) {
    %c0_i32 = arith.constant 0 : i32
    %c0_i32_0 = arith.constant 0 : i32
    return %arg0, %c0_i32 : i32, i32
  }
  func.func @transform_3(%arg0: i32, %arg1: i32) -> (i32, i32) {
    %c0_i32 = arith.constant 0 : i32
    %c0_i32_0 = arith.constant 0 : i32
    return %c0_i32, %arg1 : i32, i32
  }
  func.func @transform_4(%arg0: i32, %arg1: i32) -> (i32, i32) {
    %c0_i32 = arith.constant 0 : i32
    %c0_i32_0 = arith.constant 0 : i32
    return %arg0, %c0_i32 : i32, i32
  }
}

</mosaic_0001>

<bundles_post_ra>
// kernel: tpu_custom_call.1
= control target key start
LH: loop header
LB: loop body
LE: loop exit
PB: predicated region body
PF: predicated region fallthrough
CT: control target
= control target key end

     0   :  { %vm167_vm0 = vcmask 261120   ;;  %v1193_v3 = vmov 0   ;;  %s1714_s0 = inlined_call_operand.vmem [shape: bf16[128,32], index: 0, kind: input, shape index: {}]   ;;  %s1715_s1 = inlined_call_operand.vmem [shape: bf16[128,32], index: 1, kind: input, shape index: {}]   ;;  %s1716_s2 = inlined_call_operand.vmem [shape: s32[128,1], index: 2, kind: input, shape index: {}]   ;;  %s1717_s3 = inlined_call_operand.vmem [shape: s32[1,128], index: 3, kind: input, shape index: {}]   ;;  %s1718_s4 = inlined_call_operand.hbm [shape: f32[128,128], index: 4, kind: output, shape index: {}]  }
   0x1   :  { %v1089_v0 = vld [vmem:[%s1715_s1] sm:$0xff]   ;;  %v1090_v1 = vld [vmem:[%s1715_s1 + $0x8] sm:$0xff]   ;;  %1088 = vset.pattern.permute.xlu1 %v1193_v3  ;;  %1087 = vset.pattern.permute.xlu0 %v1193_v3  ;;  %v1091_v4 = vld [vmem:[%s1715_s1 + $0x10] sm:$0xff]  }
   0x2   :  { %1067 = vmatprep.subr.msk.bf16.mxu0 %vm167_vm0, %v1089_v0  ;;  %1068 = vmatprep.subr.msk.bf16.mxu1 %vm167_vm0, %v1089_v0  ;;  %v193_v2 = vsel %vm167_vm0, %v1089_v0, 0  ;;  %v196_v5 = vsel %vm167_vm0, %v1090_v1, 0  ;;  %v1097_v6 = vld [vmem:[%s1714_s0] sm:$0xff]   ;;  %v199_v8 = vsel %vm167_vm0, %v1091_v4, 0  ;;  %v1092_v9 = vld [vmem:[%s1715_s1 + $0x18] sm:$0xff]   ;;  %v315_v10 = vld [vmem:[%s1716_s2 + $0x10] sm:$0xff] }
   0x3   :  { %1020 = vmatpush3.bf16.xpose.msra.mxu0 %v193_v2  ;;  %1059 = vmatpush3.bf16.xpose.msra.mxu1 %v193_v2  ;;  %v1098_v7 = vld [vmem:[%s1714_s0 + $0x20] sm:$0xff]   ;;  %v316_v12 = vld [vmem:[%s1716_s2 + $0x18] sm:$0xff]  ;;  %v314_v13 = vld [vmem:[%s1716_s2 + $0x8] sm:$0xff] }
   0x4   :  { %1069 = vmatprep.subr.msk.bf16.mxu0 %vm167_vm0, %v1090_v1  ;;  %1070 = vmatprep.subr.msk.bf16.mxu1 %vm167_vm0, %v1090_v1  ;;  %v313_v11 = vld [vmem:[%s1716_s2] sm:$0xff] }
   0x5   :  { %1035 = vmatprep.mubr.msk.bf16.mxu0 %vm167_vm0, %v1097_v6  ;;  %1043 = vmatprep.mubr.msk.bf16.mxu1 %vm167_vm0, %v1098_v7 }
   0x6   :  { %337 = vperm.xlu1 %1088, %v315_v10   ;;  %331 = vperm.xlu0 %1087, %v313_v11  }
   0xa   :  { %340 = vperm.xlu1 %1088, %v316_v12   ;;  %334 = vperm.xlu0 %1087, %v314_v13  }
   0xb   :  { %1022 = vmatpush3.bf16.xpose.msra.mxu0 %v196_v5  ;;  %1060 = vmatpush3.bf16.xpose.msra.mxu1 %v196_v5 }
   0xc   :  { %1071 = vmatprep.subr.msk.bf16.mxu0 %vm167_vm0, %v1091_v4  ;;  %1072 = vmatprep.subr.msk.bf16.mxu1 %vm167_vm0, %v1091_v4 }
  0x13   :  { %1024 = vmatpush3.bf16.xpose.msra.mxu0 %v199_v8  ;;  %1061 = vmatpush3.bf16.xpose.msra.mxu1 %v199_v8 }
  0x14   :  { %1073 = vmatprep.subr.msk.bf16.mxu0 %vm167_vm0, %v1092_v9  ;;  %1074 = vmatprep.subr.msk.bf16.mxu1 %vm167_vm0, %v1092_v9 }
  0x15   :  { %9 = vsyncpa [#allocation5], 0  ;;  %v318_v14 = vld [vmem:[%s1716_s2 + $0x28] sm:$0xff]  ;;  %v317_v15 = vld [vmem:[%s1716_s2 + $0x20] sm:$0xff]  ;;  %v202_v16 = vsel %vm167_vm0, %v1092_v9, 0  ;;  %v404_v44 = vlaneseq }
  0x16   :  { %v1093_v17 = vld [vmem:[%s1715_s1 + $0x20] sm:$0xff]   ;;  %346 = vperm.xlu1 %1088, %v318_v14   ;;  %343 = vperm.xlu0 %1087, %v317_v15   ;;  %v320_v18 = vld [vmem:[%s1716_s2 + $0x38] sm:$0xff]  ;;  %v319_v19 = vld [vmem:[%s1716_s2 + $0x30] sm:$0xff] }
  0x17   :  { %v322_v20 = vld [vmem:[%s1716_s2 + $0x48] sm:$0xff]  ;;  %v321_v21 = vld [vmem:[%s1716_s2 + $0x40] sm:$0xff]  ;;  %v205_v22 = vsel %vm167_vm0, %v1093_v17, 0  ;;  %v324_v24 = vld [vmem:[%s1716_s2 + $0x58] sm:$0xff]  ;;  %v1354_v46 = vshrl.u32 %v404_v44, 7  ;;  %v1359_v50 = vand.u32 127, %v404_v44 }
  0x18   :  { %v1094_v23 = vld [vmem:[%s1715_s1 + $0x28] sm:$0xff]   ;;  %v323_v25 = vld [vmem:[%s1716_s2 + $0x50] sm:$0xff]  ;;  %v325_v27 = vld [vmem:[%s1716_s2 + $0x60] sm:$0xff] }
  0x19   :  { %v326_v26 = vld [vmem:[%s1716_s2 + $0x68] sm:$0xff]  ;;  %v208_v28 = vsel %vm167_vm0, %v1094_v23, 0  ;;  %v1095_v29 = vld [vmem:[%s1715_s1 + $0x30] sm:$0xff]   ;;  %v328_v30 = vld [vmem:[%s1716_s2 + $0x78] sm:$0xff]  ;;  %v407_v49 = vadd.s32 16, %v1354_v46  ;;  %vm459_vm2 = vcmp.lt.s32.totalorder %v1359_v50, 16  ;;  %vm443_vm6 = vcmp.ne.s32.totalorder %v1354_v46, %v1359_v50 }
  0x1a   :  { %352 = vperm.xlu1 %1088, %v320_v18   ;;  %349 = vperm.xlu0 %1087, %v319_v19   ;;  %v327_v31 = vld [vmem:[%s1716_s2 + $0x70] sm:$0xff]  ;;  %v211_v32 = vsel %vm167_vm0, %v1095_v29, 0  ;;  %v1096_v33 = vld [vmem:[%s1715_s1 + $0x38] sm:$0xff]   ;;  %v1099_v35 = vld [vmem:[%s1714_s0 + $0x8] sm:$0xff]   ;;  %v408_v53 = vadd.s32 24, %v1354_v46  ;;  %v406_v55 = vadd.s32 8, %v1354_v46 }
  0x1b   :  { %1026 = vmatpush3.bf16.xpose.msra.mxu0 %v202_v16  ;;  %1062 = vmatpush3.bf16.xpose.msra.mxu1 %v202_v16  ;;  %v214_v34 = vsel %vm167_vm0, %v1096_v33, 0  ;;  %v1100_v36 = vld [vmem:[%s1714_s0 + $0x28] sm:$0xff]   ;;  %v1101_v37 = vld [vmem:[%s1714_s0 + $0x10] sm:$0xff]   ;;  %v1103_v39 = vld [vmem:[%s1714_s0 + $0x18] sm:$0xff]   ;;  %vm445_vm1 = vcmp.ne.s32.totalorder %v407_v49, %v1359_v50  ;;  %v411_v59 = vadd.s32 48, %v1354_v46  ;;  %v412_v62 = vadd.s32 56, %v1354_v46 }
  0x1c   :  { %1075 = vmatprep.subr.msk.bf16.mxu0 %vm167_vm0, %v1093_v17  ;;  %1076 = vmatprep.subr.msk.bf16.mxu1 %vm167_vm0, %v1093_v17  ;;  %v1102_v38 = vld [vmem:[%s1714_s0 + $0x30] sm:$0xff]   ;;  %v1104_v40 = vld [vmem:[%s1714_s0 + $0x38] sm:$0xff]   ;;  %v1364_v51 = vld [vmem:[%s1717_s3] ss:$0 sm:$0xff]  ;;  %vm446_vm5 = vcmp.ne.s32.totalorder %v408_v53, %v1359_v50  ;;  %vm444_vm8 = vcmp.ne.s32.totalorder %v406_v55, %v1359_v50  ;;  %v409_v2 = vadd.s32 32, %v1354_v46  ;;  %v420_v15 = vadd.s32 120, %v1354_v46 }
  0x1d   :  { %vm1375_vm4 = vmand %vm445_vm1, %vm459_vm2  ;;  %v419_v56 = vadd.s32 112, %v1354_v46  ;;  %s1194_s3 = smov [#allocation4]  }
  0x1e   :  { %358 = vperm.xlu1 %1088, %v322_v20   ;;  %355 = vperm.xlu0 %1087, %v321_v21   ;;  %vm1397_vm10 = vmand %vm446_vm5, %vm459_vm2  ;;  %v410_v20 = vadd.s32 40, %v1354_v46  ;;  %s967_s26 = sshll.u32 %s1194_s3, 4  ;;  %s968_s26 = int_to_ptr.vmem [resolvable:$true] %s967_s26 }
  0x1f   :  { %vm1407_vm12 = vmand %vm443_vm6, %vm459_vm2  ;;  %vm447_vm6 = vcmp.ne.s32.totalorder %v409_v2, %v1359_v50  ;;  %s1169_s27 = scalar_lea.vmem %s968_s26, 2048  ;;  %p1174_p1 = scmp.lt.s32.totalorder %s968_s26, %s968_s26 }
  0x20   :  { %vm1420_vm14 = vmand %vm444_vm8, %vm459_vm2  ;;  %p1170_p0 = scmp.ne.s32.totalorder %s968_s26, %s1169_s27  ;;  %p1175_p2 = scmp.lt.s32.totalorder %s1169_s27, %s1169_s27 }
  0x22   :  { %364 = vperm.xlu1 %1088, %v324_v24   ;;  %361 = vperm.xlu0 %1087, %v323_v25   ;;  %p1176_p3 = por %p1175_p2, %p1174_p1 }
  0x23   :  { %1028 = vmatpush3.bf16.xpose.msra.mxu0 %v205_v22  ;;  %1063 = vmatpush3.bf16.xpose.msra.mxu1 %v205_v22 }
  0x24   :  { %1077 = vmatprep.subr.msk.bf16.mxu0 %vm167_vm0, %v1094_v23  ;;  %1078 = vmatprep.subr.msk.bf16.mxu1 %vm167_vm0, %v1094_v23  ;;  %p1177_p4 = pnand %p1176_p3, %p1170_p0 }
  0x26   :  { %370 = vperm.xlu1 %1088, %v326_v26   ;;  %367 = vperm.xlu0 %1087, %v325_v27  }
  0x2a   :  { %376 = vperm.xlu1 %1088, %v328_v30   ;;  %373 = vperm.xlu0 %1087, %v327_v31   ;;  %v415_v31 = vadd.s32 80, %v1354_v46 }
  0x2b   :  { %1030 = vmatpush3.bf16.xpose.msra.mxu0 %v208_v28  ;;  %1064 = vmatpush3.bf16.xpose.msra.mxu1 %v208_v28 }
  0x2c   :  { %1079 = vmatprep.subr.msk.bf16.mxu0 %vm167_vm0, %v1095_v29  ;;  %1080 = vmatprep.subr.msk.bf16.mxu1 %vm167_vm0, %v1095_v29 }
  0x33   :  { %1032 = vmatpush3.bf16.xpose.msra.mxu0 %v211_v32  ;;  %1065 = vmatpush3.bf16.xpose.msra.mxu1 %v211_v32 }
  0x34   :  { %1081 = vmatprep.subr.msk.bf16.mxu0 %vm167_vm0, %v1096_v33  ;;  %1082 = vmatprep.subr.msk.bf16.mxu1 %vm167_vm0, %v1096_v33 }
  0x3b   :  { %1034 = vmatpush3.bf16.xpose.msra.mxu0 %v214_v34  ;;  %1066 = vmatpush3.bf16.xpose.msra.mxu1 %v214_v34 }
  0x42   :  { %1036 = vmatmul.mubr.msk.bf16.vlgmr.msra.gmra.mrb[0].mxu0 %vm167_vm0, %v1099_v35  ;;  %1044 = vmatmul.mubr.msk.bf16.vlgmr.msra.gmra.mrb[0].mxu1 %vm167_vm0, %v1100_v36 }
  0x43   :  { %1039 = vmatprep.mubr.msk.bf16.mxu0 %vm167_vm0, %v1101_v37  ;;  %1047 = vmatprep.mubr.msk.bf16.mxu1 %vm167_vm0, %v1102_v38 }
  0x4a   :  { %1040 = vmatmul.mubr.msk.bf16.gmra.mrb[4].mxu0 %vm167_vm0, %v1103_v39  ;;  %1048 = vmatmul.mubr.msk.bf16.gmra.mrb[4].mxu1 %vm167_vm0, %v1104_v40  ;;  %vm449_vm0 = vcmp.ne.s32.totalorder %v411_v59, %v1359_v50 }
  0x4b   :  { %vm1467_vm8 = vmand %vm449_vm0, %vm459_vm2 }
  0x85   :  { %v338_v41 = vpop.permute.xlu1 %337  ;;  %v332_v47 = vpop.permute.xlu0 %331 }
  0x86   :  { %vm384_vm3 = vcmp.eq.s32.totalorder %v338_v41, %v1364_v51  ;;  %vm382_vm11 = vcmp.eq.s32.totalorder %v332_v47, %v1364_v51  ;;  %v413_v47 = vadd.s32 64, %v1354_v46 }
  0x87   :  { %vm1386_vm7 = vmand %vm384_vm3, %vm1375_vm4  ;;  %vm450_vm3 = vcmp.ne.s32.totalorder %v412_v62, %v1359_v50 }
  0x88   :  { %vm1444_vm1 = vmand %vm382_vm11, %vm1407_vm12 }
  0x89   :  { %v341_v42 = vpop.permute.xlu1 %340  ;;  %v335_v52 = vpop.permute.xlu0 %334  ;;  %vm1479_vm11 = vmand %vm450_vm3, %vm459_vm2 }
  0x8a   :  { %vm385_vm9 = vcmp.eq.s32.totalorder %v341_v42, %v1364_v51  ;;  %vm383_vm13 = vcmp.eq.s32.totalorder %v335_v52, %v1364_v51 }
  0x8b   :  { %vm1432_vm15 = vmand %vm385_vm9, %vm1397_vm10 }
  0x8c   :  { %vm1456_vm5 = vmand %vm383_vm13, %vm1420_vm14 }
  0x8d   :  { %vm1485_vm13 = vmand %vm447_vm6, %vm459_vm2 }
  0x95   :  { %v1350_v43 = vpop.permute.xlu1 %346  ;;  %v1382_v57 = vpop.permute.xlu0 %343 }
  0x96   :  { %vm386_vm3 = vcmp.eq.s32.totalorder %v1382_v57, %v1364_v51 }
  0x99   :  { %v1352_v45 = vpop.permute.xlu1 %352  ;;  %v350_v16 = vpop.permute.xlu0 %349 }
  0x9a   :  { %vm389_vm9 = vcmp.eq.s32.totalorder %v1352_v45, %v1364_v51 }
  0x9d   :  { %v1356_v48 = vpop.permute.xlu1 %358 }
  0xa1   :  { %v1369_v54 = vpop.permute.xlu1 %364 }
  0xa5   :  { %v1393_v60 = vpop.permute.xlu1 %370 }
  0xa9   :  { %v377_v24 = vpop.permute.xlu1 %376 }
  0xaa   :  { %vm397_vm6 = vcmp.eq.s32.totalorder %v377_v24, %v1364_v51 }
 0x115   :  { %v1037_v63 = vpop.f32.mrb[0].mxu0  ;;  %v1403_v0 = vpop.f32.mrb[0].mxu1 }
 0x116   :  { %v528_v3 = vmul.f32 1.442695, %v1403_v0  ;;  %v250_v4 = vpop.f32.mrb[1].mxu0  ;;  %v1414_v5 = vpop.f32.mrb[1].mxu1  ;;  %v512_v7 = vmul.f32 1.442695, %v1037_v63 }
 0x117   :  { %v1424_v8 = vpop.f32.mrb[2].mxu1  ;;  %v606_v9 = vsel %vm1386_vm7, %v1037_v63, 0.0  ;;  %v524_v11 = vmul.f32 1.442695, %v1414_v5  ;;  %v1038_v12 = vpop.f32.mrb[2].mxu0  ;;  %vm388_vm7 = vcmp.eq.s32.totalorder %v350_v16, %v1364_v51  ;;  %v604_v22 = vsel %vm1444_vm1, %v250_v4, 0.0 }
 0x118   :  { %870 = vadd.xlane.f32.xlu1 %v606_v9  ;;  %v1438_v13 = vpop.f32.mrb[3].mxu1  ;;  %1105 = vpow2.f32 %v528_v3  ;;  %v253_v17 = vpop.f32.mrb[3].mxu0  ;;  %v607_v18 = vsel %vm1432_vm15, %v1038_v12, 0.0  ;;  %v508_v25 = vmul.f32 1.442695, %v250_v4  ;;  %vm458_vm15 = vcmp.ne.s32.totalorder %v420_v15, %v1359_v50  ;;  %vm1498_vm0 = vmand %vm388_vm7, %vm1467_vm8 }
 0x119   :  { %872 = vadd.xlane.f32.xlu0 %v607_v18  ;;  %1107 = vpow2.f32 %v512_v7  ;;  %v605_v28 = vsel %vm1456_vm5, %v253_v17, 0.0  ;;  %vm448_vm1 = vcmp.ne.s32.totalorder %v410_v20, %v1359_v50  ;;  %v510_v32 = vmul.f32 1.442695, %v253_v17  ;;  %vm1513_vm5 = vmand %vm389_vm9, %vm1479_vm11 }
 0x11a   :  { %1109 = vpow2.f32 %v524_v11  ;;  %vm1526_vm7 = vmand %vm458_vm15, %vm459_vm2  ;;  %v514_v39 = vmul.f32 1.442695, %v1038_v12  ;;  %vm453_vm9 = vcmp.ne.s32.totalorder %v415_v31, %v1359_v50  ;;  %v530_v55 = vmul.f32 1.442695, %v1424_v8 }
 0x11b   :  { %1111 = vpow2.f32 %v508_v25  ;;  %vm480_vm15 = vmand %vm386_vm3, %vm1485_vm13  ;;  %vm1751_vm3 = vcmp.eq.s32.totalorder %v1350_v43, %v1364_v51  ;;  %v526_v4 = vmul.f32 1.442695, %v1438_v13  ;;  %v416_v17 = vadd.s32 88, %v1354_v46 }
 0x11c   :  { %866 = vadd.xlane.f32.xlu1 %v604_v22  ;;  %1113 = vpow2.f32 %v510_v32 }
 0x11d   :  { %v1490_v27 = vpop.f32.mrb[4].mxu1  ;;  %v1041_v29 = vpop.f32.mrb[4].mxu0  ;;  %868 = vadd.xlane.f32.xlu0 %v605_v28  ;;  %1115 = vpow2.f32 %v514_v39  ;;  %v414_v28 = vadd.s32 72, %v1354_v46 }
 0x11e   :  { %v266_v33 = vpop.f32.mrb[5].mxu0  ;;  %v1506_v34 = vpop.f32.mrb[5].mxu1  ;;  %v610_v37 = vsel %vm1498_vm0, %v1041_v29, 0.0  ;;  %vm1538_vm0 = vmand %vm448_vm1, %vm459_vm2  ;;  %v520_v49 = vmul.f32 1.442695, %v1041_v29 }
 0x11f   :  { %v1518_v36 = vpop.f32.mrb[6].mxu1  ;;  %v1042_v40 = vpop.f32.mrb[6].mxu0  ;;  %vm1555_vm1 = vmand %vm397_vm6, %vm1526_vm7  ;;  %v608_v57 = vsel %vm480_vm15, %v266_v33, 0.0  ;;  %v536_v59 = vmul.f32 1.442695, %v1490_v27  ;;  %vm451_vm15 = vcmp.ne.s32.totalorder %v413_v47, %v1359_v50 }
 0x120   :  { %878 = vadd.xlane.f32.xlu1 %v610_v37  ;;  %v1532_v41 = vpop.f32.mrb[7].mxu1  ;;  %v269_v44 = vpop.f32.mrb[7].mxu0  ;;  %v611_v45 = vsel %vm1513_vm5, %v1042_v40, 0.0  ;;  %vm481_vm5 = vmand %vm1751_vm3, %vm1538_vm0  ;;  %v619_v58 = vsel %vm1555_vm1, %v1518_v36, 0.0  ;;  %1117 = vpow2.f32 %v520_v49  ;;  %v516_v12 = vmul.f32 1.442695, %v266_v33 }
 0x121   :  { %880 = vadd.xlane.f32.xlu0 %v611_v45  ;;  %vm1571_vm6 = vmand %vm453_vm9, %vm459_vm2  ;;  %v609_v2 = vsel %vm481_vm5, %v269_v44, 0.0  ;;  %1119 = vpow2.f32 %v530_v55  ;;  %v532_v14 = vmul.f32 1.442695, %v1506_v34  ;;  %v522_v16 = vmul.f32 1.442695, %v1042_v40  ;;  %v356_v37 = vpop.permute.xlu0 %355 }
 0x122   :  { %v1106_v53 = vpop.eup %1105  ;;  %1121 = vpow2.f32 %v536_v59  ;;  %vm1581_vm9 = vmand %vm451_vm15, %vm459_vm2  ;;  %v538_v24 = vmul.f32 1.442695, %v1518_v36  ;;  %v518_v31 = vmul.f32 1.442695, %v269_v44  ;;  %v417_v33 = vadd.s32 96, %v1354_v46 }
 0x123   :  { %v1108_v63 = vpop.eup %1107  ;;  %v550_v43 = vsel %vm1571_vm6, %v1106_v53, 0.0  ;;  %1123 = vpow2.f32 %v526_v4  ;;  %v534_v40 = vmul.f32 1.442695, %v1532_v41 }
 0x124   :  { %874 = vadd.xlane.f32.xlu1 %v608_v57  ;;  %v1110_v3 = vpop.eup %1109  ;;  %v542_v9 = vsel %vm1375_vm4, %v1108_v63, 0.0  ;;  %1125 = vpow2.f32 %v516_v12  ;;  %vm454_vm4 = vcmp.ne.s32.totalorder %v416_v17, %v1359_v50  ;;  %vm455_vm5 = vcmp.ne.s32.totalorder %v417_v33, %v1359_v50 }
 0x125   :  { %876 = vadd.xlane.f32.xlu0 %v609_v2  ;;  %v548_v10 = vsel %vm1581_vm9, %v1110_v3, 0.0  ;;  %v1112_v11 = vpop.eup %1111  ;;  %1127 = vpow2.f32 %v532_v14  ;;  %v362_v55 = vpop.permute.xlu0 %361  ;;  %vm1636_vm15 = vmand %vm455_vm5, %vm459_vm2 }
 0x126   :  { %v1114_v15 = vpop.eup %1113  ;;  %v540_v18 = vsel %vm1407_vm12, %v1112_v11, 0.0  ;;  %1129 = vpow2.f32 %v522_v16  ;;  %vm457_vm12 = vcmp.ne.s32.totalorder %v419_v56, %v1359_v50 }
 0x127   :  { %v1116_v19 = vpop.eup %1115  ;;  %v541_v20 = vsel %vm1420_vm14, %v1114_v15, 0.0  ;;  %vm1606_vm14 = vmand %vm454_vm4, %vm459_vm2  ;;  %1131 = vpow2.f32 %v538_v24  ;;  %vm390_vm4 = vcmp.eq.s32.totalorder %v356_v37, %v1364_v51 }
 0x128   :  { %838 = vadd.xlane.f32.xlu1 %v550_v43  ;;  %v543_v1 = vsel %vm1397_vm10, %v1116_v19, 0.0  ;;  %vm1612_vm10 = vmand %vm457_vm12, %vm459_vm2  ;;  %1133 = vpow2.f32 %v518_v31  ;;  %vm392_vm12 = vcmp.eq.s32.totalorder %v362_v55, %v1364_v51  ;;  %v418_v43 = vadd.s32 104, %v1354_v46 }
 0x129   :  { %822 = vadd.xlane.f32.xlu0 %v542_v9  ;;  %1135 = vpow2.f32 %v534_v40  ;;  %v368_v4 = vpop.permute.xlu0 %367 }
 0x12a   :  { %v1118_v22 = vpop.eup %1117 }
 0x12b   :  { %v1120_v25 = vpop.eup %1119  ;;  %v546_v6 = vsel %vm1467_vm8, %v1118_v22, 0.0  ;;  %vm452_vm8 = vcmp.ne.s32.totalorder %v414_v28, %v1359_v50 }
 0x12c   :  { %834 = vadd.xlane.f32.xlu1 %v548_v10  ;;  %v1122_v29 = vpop.eup %1121  ;;  %v551_v32 = vsel %vm1606_vm14, %v1120_v25, 0.0  ;;  %vm1625_vm3 = vmand %vm452_vm8, %vm459_vm2 }
 0x12d   :  { %818 = vadd.xlane.f32.xlu0 %v540_v18  ;;  %v554_v21 = vsel %vm1612_vm10, %v1122_v29, 0.0  ;;  %v1124_v35 = vpop.eup %1123  ;;  %v374_v38 = vpop.permute.xlu0 %373 }
 0x12e   :  { %v1126_v39 = vpop.eup %1125  ;;  %v549_v47 = vsel %vm1625_vm3, %v1124_v35, 0.0  ;;  %vm396_vm5 = vcmp.eq.s32.totalorder %v374_v38, %v1364_v51 }
 0x12f   :  { %v1128_v45 = vpop.eup %1127  ;;  %v544_v53 = vsel %vm1485_vm13, %v1126_v39, 0.0  ;;  %vm484_vm13 = vmand %vm390_vm4, %vm1581_vm9  ;;  %vm456_vm9 = vcmp.ne.s32.totalorder %v418_v43, %v1359_v50  ;;  %vm393_vm4 = vcmp.eq.s32.totalorder %v1369_v54, %v1364_v51 }
 0x130   :  { %820 = vadd.xlane.f32.xlu1 %v541_v20  ;;  %v1130_v49 = vpop.eup %1129  ;;  %v552_v63 = vsel %vm1636_vm15, %v1128_v45, 0.0  ;;  %v612_v23 = vsel %vm484_vm13, %v1414_v5, 0.0  ;;  %vm1661_vm8 = vmand %vm456_vm9, %vm459_vm2 }
 0x131   :  { %824 = vadd.xlane.f32.xlu0 %v543_v1  ;;  %v547_v59 = vsel %vm1479_vm11, %v1130_v49, 0.0  ;;  %v1132_v2 = vpop.eup %1131  ;;  %vm486_vm11 = vmand %vm392_vm12, %vm1571_vm6  ;;  %vm391_vm6 = vcmp.eq.s32.totalorder %v1356_v48, %v1364_v51  ;;  %vm395_vm12 = vcmp.eq.s32.totalorder %v1393_v60, %v1364_v51 }
 0x132   :  { %v555_v26 = vsel %vm1526_vm7, %v1132_v2, 0.0  ;;  %v1134_v3 = vpop.eup %1133  ;;  %vm394_vm7 = vcmp.eq.s32.totalorder %v368_v4, %v1364_v51  ;;  %v614_v46 = vsel %vm486_vm11, %v1403_v0, 0.0  ;;  %vm485_vm2 = vmand %vm391_vm6, %vm1625_vm3 }
 0x133   :  { %v545_v7 = vsel %vm1538_vm0, %v1134_v3, 0.0  ;;  %v1136_v9 = vpop.eup %1135  ;;  %vm488_vm0 = vmand %vm394_vm7, %vm1636_vm15  ;;  %v613_v48 = vsel %vm485_vm2, %v1438_v13, 0.0 }
 0x134   :  { %830 = vadd.xlane.f32.xlu1 %v546_v6  ;;  %v553_v42 = vsel %vm1661_vm8, %v1136_v9, 0.0  ;;  %v616_v0 = vsel %vm488_vm0, %v1506_v34, 0.0  ;;  %vm490_vm13 = vmand %vm396_vm5, %vm1612_vm10 }
 0x135   :  { %840 = vadd.xlane.f32.xlu0 %v551_v32  ;;  %v618_v50 = vsel %vm490_vm13, %v1490_v27, 0.0  ;;  %vm487_vm15 = vmand %vm393_vm4, %vm1606_vm14 }
 0x136   :  { %v615_v34 = vsel %vm487_vm15, %v1424_v8, 0.0  ;;  %vm489_vm3 = vmand %vm395_vm12, %vm1661_vm8 }
 0x137   :  { %v617_v54 = vsel %vm489_vm3, %v1532_v41, 0.0 }
 0x138   :  { %846 = vadd.xlane.f32.xlu1 %v554_v21 }
 0x139   :  { %836 = vadd.xlane.f32.xlu0 %v549_v47 }
 0x13c   :  { %826 = vadd.xlane.f32.xlu1 %v544_v53 }
 0x13d   :  { %832 = vadd.xlane.f32.xlu0 %v547_v59 }
 0x140   :  { %842 = vadd.xlane.f32.xlu1 %v552_v63 }
 0x141   :  { %848 = vadd.xlane.f32.xlu0 %v555_v26 }
 0x144   :  { %882 = vadd.xlane.f32.xlu1 %v612_v23 }
 0x145   :  { %828 = vadd.xlane.f32.xlu0 %v545_v7 }
 0x148   :  { %886 = vadd.xlane.f32.xlu1 %v614_v46 }
 0x149   :  { %844 = vadd.xlane.f32.xlu0 %v553_v42 }
 0x14c   :  { %890 = vadd.xlane.f32.xlu1 %v616_v0 }
 0x14d   :  { %884 = vadd.xlane.f32.xlu0 %v613_v48 }
 0x150   :  { %894 = vadd.xlane.f32.xlu1 %v618_v50 }
 0x151   :  { %888 = vadd.xlane.f32.xlu0 %v615_v34 }
 0x155   :  { %892 = vadd.xlane.f32.xlu0 %v617_v54 }
 0x159   :  { %896 = vadd.xlane.f32.xlu0 %v619_v58 }
 0x1a5   :  { %v871_v13 = vpop.xlane.xlu1 %870 }
 0x1a6   :  { %v873_v27 = vpop.xlane.xlu0 %872 }
 0x1a9   :  { %v867_v62 = vpop.xlane.xlu1 %866 }
 0x1aa   :  { %v869_v10 = vpop.xlane.xlu0 %868 }
 0x1ad   :  { %v879_v11 = vpop.xlane.xlu1 %878 }
 0x1ae   :  { %v1693_v51 = vpop.xlane.xlu0 %880 }
 0x1b1   :  { %v1695_v60 = vpop.xlane.xlu1 %874 }
 0x1b2   :  { %v1697_v8 = vpop.xlane.xlu0 %876 }
 0x1b5   :  { %v839_v12 = vpop.xlane.xlu1 %838 }
 0x1b6   :  { %v823_v14 = vpop.xlane.xlu0 %822 }
 0x1b7   :  { %1137 = vlog2.f32 %v823_v14 }
 0x1b9   :  { %v835_v41 = vpop.xlane.xlu1 %834 }
 0x1ba   :  { %v819_v15 = vpop.xlane.xlu0 %818 }
 0x1bb   :  { %1139 = vlog2.f32 %v819_v15 }
 0x1bd   :  { %v821_v52 = vpop.xlane.xlu1 %820 }
 0x1be   :  { %1141 = vlog2.f32 %v821_v52  ;;  %v825_v36 = vpop.xlane.xlu0 %824 }
 0x1bf   :  { %1143 = vlog2.f32 %v825_v36 }
 0x1c1   :  { %v831_v58 = vpop.xlane.xlu1 %830  ;;  %v1138_v16 = vpop.eup %1137 }
 0x1c2   :  { %1145 = vlog2.f32 %v831_v58  ;;  %v903_v17 = vmul.f32 0.6931472, %v1138_v16  ;;  %v841_v18 = vpop.xlane.xlu0 %840 }
 0x1c3   :  { %1147 = vlog2.f32 %v835_v41 }
 0x1c4   :  { %v932_v56 = vsub.f32 %v871_v13, %v903_v17  ;;  %1149 = vlog2.f32 %v839_v12 }
 0x1c5   :  { %v847_v19 = vpop.xlane.xlu1 %846  ;;  %v1140_v20 = vpop.eup %1139 }
 0x1c6   :  { %948 = vst [vmem:[#allocation4 + $0x10] sm:$0xff] %v932_v56  ;;  %v899_v22 = vmul.f32 0.6931472, %v1140_v20  ;;  %v837_v24 = vpop.xlane.xlu0 %836 }
 0x1c8   :  { %v1142_v25 = vpop.eup %1141  ;;  %v930_v1 = vsub.f32 %v867_v62, %v899_v22 }
 0x1c9   :  { %v901_v28 = vmul.f32 0.6931472, %v1142_v25  ;;  %v827_v29 = vpop.xlane.xlu1 %826  ;;  %v1144_v6 = vpop.eup %1143 }
 0x1ca   :  { %1151 = vlog2.f32 %v827_v29  ;;  %946 = vst [vmem:[#allocation4] sm:$0xff] %v930_v1  ;;  %v905_v31 = vmul.f32 0.6931472, %v1144_v6  ;;  %v833_v61 = vpop.xlane.xlu0 %832 }
 0x1cb   :  { %v931_v30 = vsub.f32 %v869_v10, %v901_v28  ;;  %1153 = vlog2.f32 %v833_v61 }
 0x1cc   :  { %v1146_v32 = vpop.eup %1145  ;;  %v933_v33 = vsub.f32 %v873_v27, %v905_v31  ;;  %1155 = vlog2.f32 %v837_v24 }
 0x1cd   :  { %v1148_v21 = vpop.eup %1147  ;;  %947 = vst [vmem:[#allocation4 + $0x8] sm:$0xff] %v931_v30  ;;  %v911_v35 = vmul.f32 0.6931472, %v1146_v32  ;;  %v843_v37 = vpop.xlane.xlu1 %842 }
 0x1ce   :  { %1157 = vlog2.f32 %v843_v37  ;;  %949 = vst [vmem:[#allocation4 + $0x18] sm:$0xff] %v933_v33  ;;  %v849_v40 = vpop.xlane.xlu0 %848  ;;  %v915_v44 = vmul.f32 0.6931472, %v1148_v21  ;;  %v1150_v45 = vpop.eup %1149 }
 0x1cf   :  { %v936_v39 = vsub.f32 %v879_v11, %v911_v35  ;;  %1159 = vlog2.f32 %v847_v19  ;;  %v919_v57 = vmul.f32 0.6931472, %v1150_v45 }
 0x1d0   :  { %1161 = vlog2.f32 %v841_v18 }
 0x1d1   :  { %952 = vst [vmem:[#allocation4 + $0x30] sm:$0xff] %v936_v39  ;;  %v883_v47 = vpop.xlane.xlu1 %882 }
 0x1d2   :  { %v938_v49 = vsub.f32 %v883_v47, %v915_v44  ;;  %v829_v53 = vpop.xlane.xlu0 %828 }
 0x1d3   :  { %1163 = vlog2.f32 %v829_v53 }
 0x1d4   :  { %v1152_v55 = vpop.eup %1151  ;;  %954 = vst [vmem:[#allocation4 + $0x40] sm:$0xff] %v938_v49 }
 0x1d5   :  { %v907_v59 = vmul.f32 0.6931472, %v1152_v55  ;;  %v887_v63 = vpop.xlane.xlu1 %886  ;;  %v1154_v2 = vpop.eup %1153 }
 0x1d6   :  { %v940_v26 = vsub.f32 %v887_v63, %v919_v57  ;;  %v1156_v43 = vpop.eup %1155  ;;  %v913_v4 = vmul.f32 0.6931472, %v1154_v2  ;;  %v845_v23 = vpop.xlane.xlu0 %844 }
 0x1d7   :  { %v934_v3 = vsub.f32 %v1695_v60, %v907_v59  ;;  %1165 = vlog2.f32 %v845_v23  ;;  %v917_v42 = vmul.f32 0.6931472, %v1156_v43 }
 0x1d8   :  { %v1158_v7 = vpop.eup %1157  ;;  %956 = vst [vmem:[#allocation4 + $0x50] sm:$0xff] %v940_v26  ;;  %v937_v46 = vsub.f32 %v1693_v51, %v913_v4  ;;  %1167 = vlog2.f32 %v849_v40 }
 0x1d9   :  { %v1160_v9 = vpop.eup %1159  ;;  %950 = vst [vmem:[#allocation4 + $0x20] sm:$0xff] %v934_v3  ;;  %v923_v38 = vmul.f32 0.6931472, %v1158_v7  ;;  %v891_v5 = vpop.xlane.xlu1 %890 }
 0x1da   :  { %v1162_v0 = vpop.eup %1161  ;;  %953 = vst [vmem:[#allocation4 + $0x38] sm:$0xff] %v937_v46  ;;  %v885_v50 = vpop.xlane.xlu0 %884  ;;  %v927_v54 = vmul.f32 0.6931472, %v1160_v9 }
 0x1db   :  { %v942_v48 = vsub.f32 %v891_v5, %v923_v38  ;;  %v939_v34 = vsub.f32 %v885_v50, %v917_v42  ;;  %v921_v10 = vmul.f32 0.6931472, %v1162_v0 }
 0x1dd   :  { %958 = vst [vmem:[#allocation4 + $0x60] sm:$0xff] %v942_v48  ;;  %v895_v13 = vpop.xlane.xlu1 %894  ;;  %v1164_v27 = vpop.eup %1163  ;;  %955 = vst [vmem:[#allocation4 + $0x48] sm:$0xff] %v939_v34 }
 0x1de   :  { %v944_v62 = vsub.f32 %v895_v13, %v927_v54  ;;  %v909_v11 = vmul.f32 0.6931472, %v1164_v27  ;;  %v889_v60 = vpop.xlane.xlu0 %888 }
 0x1df   :  { %v941_v51 = vsub.f32 %v889_v60, %v921_v10 }
 0x1e0   :  { %960 = vst [vmem:[#allocation4 + $0x70] sm:$0xff] %v944_v62  ;;  %v935_v12 = vsub.f32 %v1697_v8, %v909_v11 }
 0x1e1   :  { %v1166_v14 = vpop.eup %1165  ;;  %957 = vst [vmem:[#allocation4 + $0x58] sm:$0xff] %v941_v51 }
 0x1e2   :  { %v1168_v41 = vpop.eup %1167  ;;  %951 = vst [vmem:[#allocation4 + $0x28] sm:$0xff] %v935_v12  ;;  %v925_v15 = vmul.f32 0.6931472, %v1166_v14  ;;  %v893_v52 = vpop.xlane.xlu0 %892 }
 0x1e3   :  { %v929_v58 = vmul.f32 0.6931472, %v1168_v41 }
 0x1e4   :  { %v943_v36 = vsub.f32 %v893_v52, %v925_v15 }
 0x1e6   :  { %959 = vst [vmem:[#allocation4 + $0x68] sm:$0xff] %v943_v36  ;;  %v897_v16 = vpop.xlane.xlu0 %896 }
 0x1e7   :  { %v945_v17 = vsub.f32 %v897_v16, %v929_v58 }
 0x1e9   :  { %961 = vst [vmem:[#allocation4 + $0x78] sm:$0xff] %v945_v17 }
 0x1ea   :  { %1180 = shalt.err (!%p1177_p4)
}
 0x1eb   :  { %s1181_s30 = scalar_lea.hbm %s1718_s4, 2048 }
 0x1ec   :  { %p1182_p5 = scmp.ne.s32.totalorder %s1718_s4, %s1181_s30  ;;  %p1185_p6 = scmp.lt.u32.totalorder %s1181_s30, %s1718_s4 }
 0x1ee   :  { %p1187_p7 = pnand %p1185_p6, %p1182_p5 }
 0x1f0   :  { %1190 = shalt.err (!%p1187_p7)
}
 0x1f1   :  { %s1195_s9 = smov 128   ;;  %s1196_s10 = smov 8  }
 0x1f2   :  { %973 = dma.vmem_to_hbm [thread:$0]  %s968_s26, 2048, %s1718_s4, [#allocation5], %s1195_s9, %s1195_s9, %s1196_s10  }
 0x1f3   :  { %1191 = dma.done.wait [#allocation5], 2048  }
 0x1f4   :  { %1192 = vsyncadd [#allocation5], 4294965248 }
 0x1f5   :  { %977 = vsyncpa [#allocation5], 1 }

</bundles_post_ra>
